<compile_context>
chip_gen: v7x
topology: tpu7x:2x2x1
jax: 0.10.0
libtpu: 0.0.40
codegen_flags: <defaults>
</compile_context>

<pallas_src>
import functools

import jax
import jax.numpy as jnp
from jax.experimental import pallas as pl
from jax.experimental.pallas import tpu as pltpu


def _round_up(n: int, m: int) -> int:
    return ((n + m - 1) // m) * m


def _predict_mlp_kernel(x_ref, w1_ref, b1_ref, w2_ref, b2_ref, o_ref):
    """One batch tile of sigmoid(relu(x @ W1 + b1) @ W2 + b2).

    x_ref  [TB, d_in] f32 (cast to bf16 for the MXU here)
    w1_ref [d_in, H]  bf16      b1_ref [1, H] f32
    w2_ref [H, N]     bf16      b2_ref [1, N] f32   (N = d_out padded to 128)
    o_ref  [TB, N]    bf16      (f32 accumulation; f32 VPU/EUP elementwise)
    """
    x = x_ref[...].astype(jnp.bfloat16)
    h = jnp.dot(x, w1_ref[...], preferred_element_type=jnp.float32)
    h = jnp.maximum(h + b1_ref[...], 0.0)                    # bias+ReLU, f32 VPU
    y = jnp.dot(h.astype(jnp.bfloat16), w2_ref[...],
                preferred_element_type=jnp.float32)
    y = y + b2_ref[...]
    o_ref[...] = jax.nn.sigmoid(y).astype(o_ref.dtype)       # sigmoid on EUP, f32


def _pick_batch_tile(batch: int) -> int:
    """Batch tile: single step for small B, >=2 big steps for large B."""
    if batch <= 256:
        # Single grid step; multiple of 16 so bf16 tiles fill packed sublanes.
        return _round_up(max(batch, 1), 16)
    # >= 2 grid steps so dimension_semantics=("parallel",) lets v7x's two
    # TensorCores split the batch; cap at 1024 rows/tile (near HBM roofline,
    # per-step overhead amortized, still only a few MiB of VMEM per tile).
    return min(1024, _round_up((batch + 1) // 2, 16))


@functools.partial(jax.jit, static_argnames=("d_out",))
def _predict_mlp_pallas(x, w1, b1, w2_p, b2_p, *, d_out):
    """Fused prediction MLP as a batch-tiled Pallas TPU kernel.

    x:    [B, d_in]    f32 (or bf16)
    w1:   [d_in, H]    bf16        b1:   [1, H]  f32
    w2_p: [H, N]       bf16        b2_p: [1, N]  f32   (N = round_up(d_out,128))
    returns: [B, d_out] bf16
    """
    B, d_in = x.shape
    hidden = w1.shape[1]
    N = w2_p.shape[1]                       # 128-lane-dense output width

    TB = _pick_batch_tile(B)
    B_pad = _round_up(B, TB)
    n_steps = B_pad // TB

    # Pad only the batch dim, and only when needed.  d_in stays at its native
    # width (block last dim == full array dim is legal), so x is never inflated
    # to 128 lanes and no extra pad/cast kernel runs when B divides the tile.
    if B_pad != B:
        x = jnp.zeros((B_pad, d_in), x.dtype).at[:B, :].set(x)

    footprint = (
        2 * TB * d_in * x.dtype.itemsize                       # x tiles (2 bufs)
        + 2 * TB * N * 2                                       # bf16 out tiles
        + 2 * (d_in * hidden * 2 + hidden * 4 + hidden * N * 2 + N * 4)  # weights
    )
    vmem_limit = int(min(max(2 * footprint + (2 << 20), 8 << 20), 64 << 20))

    # Advisory scheduling hint, using REAL (unpadded) dims.
    cost = pl.CostEstimate(
        flops=2 * B * (d_in * hidden + hidden * d_out),
        transcendentals=B * d_out,
        bytes_accessed=(B * d_in * x.dtype.itemsize
                        + d_in * hidden * 2 + hidden * 4
                        + hidden * d_out * 2 + d_out * 4
                        + B * d_out * 2),
    )

    out_pad = pl.pallas_call(
        _predict_mlp_kernel,
        out_shape=jax.ShapeDtypeStruct((B_pad, N), jnp.bfloat16),
        grid=(n_steps,),
        in_specs=[
            pl.BlockSpec((TB, d_in), lambda i: (i, 0)),        # streamed per tile
            # Resident weights/biases (constant index_map -> fetched once and
            # kept in VMEM across the batch loop).
            # TODO(synk): when hidden/d_out scale into the thousands, add
            # pipeline_mode=pl.Buffered(1) on these resident specs (no benefit
            # at this size) and round H/N to 256 for the v6e/v7x 256-wide MXU.
            pl.BlockSpec((d_in, hidden), lambda i: (0, 0)),
            pl.BlockSpec((1, hidden), lambda i: (0, 0)),
            pl.BlockSpec((hidden, N), lambda i: (0, 0)),
            pl.BlockSpec((1, N), lambda i: (0, 0)),
        ],
        out_specs=pl.BlockSpec((TB, N), lambda i: (i, 0)),
        compiler_params=pltpu.CompilerParams(
            dimension_semantics=("parallel",),     # v7x: 2 TCs split the batch
            vmem_limit_bytes=vmem_limit,
        ),
        cost_estimate=cost,
    )(x, w1, b1, w2_p, b2_p)

    return out_pad[:B, :d_out]


class PredictModule:
    """JAX/Pallas analogue of torchrec.inference.modules.PredictModule.

    Wraps the "predict module" (here: parameters of a small prediction MLP) and
    exposes forward(batch: dict) -> dict, delegating to predict_forward under
    inference semantics (the JAX default).  Kernel-ready weights (bf16, output
    columns padded to a 128-lane-dense width) are built ONCE here, so each
    request runs exactly one fused Pallas kernel (plus an optional batch-tail
    pad).
    """

    def __init__(self, params):
        self._params = dict(params)   # the wrapped "module" state_dict (f32)
        # TODO(synk): torch.device / torch.cuda.device context management has no
        # Pallas equivalent; placement is handled by JAX's default TPU backend.

        w1 = jnp.asarray(params["w1"], jnp.float32)
        b1 = jnp.asarray(params["b1"], jnp.float32).reshape(1, -1)
        w2 = jnp.asarray(params["w2"], jnp.float32)
        b2 = jnp.asarray(params["b2"], jnp.float32).reshape(1, -1)
        d_out = w2.shape[1]
        hidden = w2.shape[0]
        n_pad = _round_up(d_out, 128)          # lane-dense output width

        # Cached kernel-ready operands: bf16 MXU weights, f32 biases.  Padded
        # output columns are zero -> sigmoid(0)=0.5 -> sliced off post-kernel.
        self._w1 = w1.astype(jnp.bfloat16)
        self._b1 = b1
        self._w2 = jnp.zeros((hidden, n_pad), jnp.bfloat16).at[:, :d_out].set(
            w2.astype(jnp.bfloat16))
        self._b2 = jnp.zeros((1, n_pad), jnp.float32).at[:, :d_out].set(b2)
        self._d_out = d_out

    @property
    def predict_module(self):
        return self._params

    def state_dict(self):
        return dict(self._params)

    def predict_forward(self, batch):
        x = batch["float_features"]
        out = _predict_mlp_pallas(x, self._w1, self._b1, self._w2, self._b2,
                                  d_out=self._d_out)
        return {"default": out}   # bf16 scores; cast downstream if f32 needed

    def forward(self, batch):
        # torch.inference_mode(): inference (no autograd state) is the JAX default.
        return self.predict_forward(batch)

    __call__ = forward


def _init_params(key, d_in, hidden, d_out):
    k1, k2, k3, k4 = jax.random.split(key, 4)
    s1 = 1.0 / jnp.sqrt(d_in)
    s2 = 1.0 / jnp.sqrt(hidden)
    return {
        "w1": jax.random.uniform(k1, (d_in, hidden), jnp.float32, -s1, s1),
        "b1": jax.random.uniform(k2, (1, hidden), jnp.float32, -s1, s1),
        "w2": jax.random.uniform(k3, (hidden, d_out), jnp.float32, -s2, s2),
        "b2": jax.random.uniform(k4, (1, d_out), jnp.float32, -s2, s2),
    }


if __name__ == "__main__":
    key = jax.random.PRNGKey(0)
    k_params, k_x = jax.random.split(key)

    batch_size, d_in, hidden, d_out = 8, 32, 64, 8
    params = _init_params(k_params, d_in, hidden, d_out)
    x = jax.random.normal(k_x, (batch_size, d_in), dtype=jnp.float32)

    module = PredictModule(params)
    out = module({"float_features": x})
    result = jax.block_until_ready(out["default"]).astype(jnp.float32)

    # Pure-JAX f32 reference of the same math.  The kernel feeds the MXU bf16
    # operands (f32 accumulation) and stores bf16, so allow bf16-level tolerance.
    h_ref = jnp.maximum(x @ params["w1"] + params["b1"], 0.0)
    y_ref = jax.nn.sigmoid(h_ref @ params["w2"] + params["b2"])
    assert result.shape == (batch_size, d_out), result.shape
    assert jnp.allclose(result, y_ref, atol=2e-2, rtol=2e-2), (
        float(jnp.max(jnp.abs(result - y_ref))))

    print("KERNEL_OK")
</pallas_src>

<mosaic_0001>
module attributes {stable_mosaic.version = 11 : i64} {
  func.func @_predict_mlp_kernel(%arg0: i32, %arg1: memref<16x32xf32, #tpu.memory_space<vmem>>, %arg2: memref<32x64xbf16, #tpu.memory_space<vmem>>, %arg3: memref<1x64xf32, #tpu.memory_space<vmem>>, %arg4: memref<64x128xbf16, #tpu.memory_space<vmem>>, %arg5: memref<1x128xf32, #tpu.memory_space<vmem>>, %arg6: memref<16x128xbf16, #tpu.memory_space<vmem>>) attributes {dimension_semantics = [#tpu.dimension_semantics<parallel>], iteration_bounds = array<i64: 1>, scalar_prefetch = 0 : i64, scratch_operands = 0 : i64, tpu.core_type = #tpu.core_type<tc>, window_params = [{transform_indices = @transform_0, window_bounds = array<i64: 16, 32>}, {pipeline_mode = #tpu.pipeline_mode<synchronous>, transform_indices = @transform_1, window_bounds = array<i64: 32, 64>}, {pipeline_mode = #tpu.pipeline_mode<synchronous>, transform_indices = @transform_2, window_bounds = array<i64: 1, 64>}, {pipeline_mode = #tpu.pipeline_mode<synchronous>, transform_indices = @transform_3, window_bounds = array<i64: 64, 128>}, {pipeline_mode = #tpu.pipeline_mode<synchronous>, transform_indices = @transform_4, window_bounds = array<i64: 1, 128>}, {transform_indices = @transform_5, window_bounds = array<i64: 16, 128>}]} {
    %c0 = arith.constant 0 : index
    %c0_0 = arith.constant 0 : index
    %0 = vector.load %arg1[%c0, %c0_0] : memref<16x32xf32, #tpu.memory_space<vmem>>, vector<16x32xf32>
    %1 = arith.truncf %0 : vector<16x32xf32> to vector<16x32xbf16>
    %c0_1 = arith.constant 0 : index
    %c0_2 = arith.constant 0 : index
    %2 = vector.load %arg2[%c0_1, %c0_2] : memref<32x64xbf16, #tpu.memory_space<vmem>>, vector<32x64xbf16>
    %cst = arith.constant dense<0.000000e+00> : vector<16x64xf32>
    %3 = tpu.matmul %1, %2, %cst {dimension_numbers = #tpu.dot_dimension_numbers<[1], [0], [0], [1], [0, 0, 1, 1], [], []>} : vector<16x32xbf16>, vector<32x64xbf16>, vector<16x64xf32> -> vector<16x64xf32>
    %c0_3 = arith.constant 0 : index
    %c0_4 = arith.constant 0 : index
    %4 = vector.load %arg3[%c0_3, %c0_4] : memref<1x64xf32, #tpu.memory_space<vmem>>, vector<1x64xf32>
    %5 = vector.broadcast %4 : vector<1x64xf32> to vector<16x64xf32>
    %6 = arith.addf %3, %5 : vector<16x64xf32>
    %cst_5 = arith.constant 0.000000e+00 : f32
    %7 = vector.broadcast %cst_5 : f32 to vector<16x64xf32>
    %8 = arith.maximumf %6, %7 : vector<16x64xf32>
    %9 = arith.truncf %8 : vector<16x64xf32> to vector<16x64xbf16>
    %c0_6 = arith.constant 0 : index
    %c0_7 = arith.constant 0 : index
    %10 = vector.load %arg4[%c0_6, %c0_7] : memref<64x128xbf16, #tpu.memory_space<vmem>>, vector<64x128xbf16>
    %cst_8 = arith.constant dense<0.000000e+00> : vector<16x128xf32>
    %11 = tpu.matmul %9, %10, %cst_8 {dimension_numbers = #tpu.dot_dimension_numbers<[1], [0], [0], [1], [0, 0, 1, 1], [], []>} : vector<16x64xbf16>, vector<64x128xbf16>, vector<16x128xf32> -> vector<16x128xf32>
    %c0_9 = arith.constant 0 : index
    %c0_10 = arith.constant 0 : index
    %12 = vector.load %arg5[%c0_9, %c0_10] : memref<1x128xf32, #tpu.memory_space<vmem>>, vector<1x128xf32>
    %13 = vector.broadcast %12 : vector<1x128xf32> to vector<16x128xf32>
    %14 = arith.addf %11, %13 : vector<16x128xf32>
    %15 = arith.negf %14 : vector<16x128xf32>
    %16 = math.exp %15 : vector<16x128xf32>
    %cst_11 = arith.constant 1.000000e+00 : f32
    %17 = vector.broadcast %cst_11 : f32 to vector<16x128xf32>
    %18 = arith.addf %17, %16 : vector<16x128xf32>
    %19 = arith.divf %17, %18 : vector<16x128xf32>
    %20 = arith.truncf %19 : vector<16x128xf32> to vector<16x128xbf16>
    %c0_12 = arith.constant 0 : index
    %c0_13 = arith.constant 0 : index
    %21 = vector.load %arg6[%c0_12, %c0_13] : memref<16x128xbf16, #tpu.memory_space<vmem>>, vector<16x128xbf16>
    tpu.vector_store %arg6[%c0_12, %c0_13], %20 {strides = array<i32>} : memref<16x128xbf16, #tpu.memory_space<vmem>>, vector<16x128xbf16>,
    return
  }
  func.func @transform_0(%arg0: i32) -> (i32, i32) {
    %c0_i32 = arith.constant 0 : i32
    %c0_i32_0 = arith.constant 0 : i32
    return %arg0, %c0_i32 : i32, i32
  }
  func.func @transform_1(%arg0: i32) -> (i32, i32) {
    %c0_i32 = arith.constant 0 : i32
    %c0_i32_0 = arith.constant 0 : i32
    %c0_i32_1 = arith.constant 0 : i32
    return %c0_i32, %c0_i32_0 : i32, i32
  }
  func.func @transform_2(%arg0: i32) -> (i32, i32) {
    %c0_i32 = arith.constant 0 : i32
    %c0_i32_0 = arith.constant 0 : i32
    %c0_i32_1 = arith.constant 0 : i32
    return %c0_i32, %c0_i32_0 : i32, i32
  }
  func.func @transform_3(%arg0: i32) -> (i32, i32) {
    %c0_i32 = arith.constant 0 : i32
    %c0_i32_0 = arith.constant 0 : i32
    %c0_i32_1 = arith.constant 0 : i32
    return %c0_i32, %c0_i32_0 : i32, i32
  }
  func.func @transform_4(%arg0: i32) -> (i32, i32) {
    %c0_i32 = arith.constant 0 : i32
    %c0_i32_0 = arith.constant 0 : i32
    %c0_i32_1 = arith.constant 0 : i32
    return %c0_i32, %c0_i32_0 : i32, i32
  }
  func.func @transform_5(%arg0: i32) -> (i32, i32) {
    %c0_i32 = arith.constant 0 : i32
    %c0_i32_0 = arith.constant 0 : i32
    return %arg0, %c0_i32 : i32, i32
  }
}

</mosaic_0001>

<bundles_post_ra>
// kernel: _predict_mlp_pallas.1
= control target key start
LH: loop header
LB: loop body
LE: loop exit
PB: predicated region body
PF: predicated region fallthrough
CT: control target
= control target key end

     0   :  { %10 = vsyncpa [#allocation3], 0  ;;  %s312_s18 = smov [#allocation2]   ;;  %s386_s0 = inlined_call_operand.vmem [shape: f32[16,32], index: 0, kind: input, shape index: {}]   ;;  %s387_s1 = inlined_call_operand.hbm [shape: bf16[32,64], index: 1, kind: input, shape index: {}]   ;;  %s388_s2 = inlined_call_operand.vmem [shape: f32[1,64], index: 2, kind: input, shape index: {}]   ;;  %s389_s3 = inlined_call_operand.vmem [shape: bf16[64,128], index: 3, kind: input, shape index: {}]   ;;  %s390_s4 = inlined_call_operand.vmem [shape: f32[1,128], index: 4, kind: input, shape index: {}]   ;;  %s391_s5 = inlined_call_operand.vmem [shape: bf16[16,128], index: 5, kind: output, shape index: {}]  }
   0x1   :  { %s18_s19 = sshll.u32 %s312_s18, 4  ;;  %s288_s22 = scalar_lea.hbm %s387_s1, 256  ;;  %s19_s19 = int_to_ptr.vmem [resolvable:$true] %s18_s19 }
   0x2   :  { %p289_p0 = scmp.ne.s32.totalorder %s387_s1, %s288_s22  ;;  %p292_p1 = scmp.lt.u32.totalorder %s288_s22, %s387_s1 }
   0x4   :  { %p294_p2 = pnand %p292_p1, %p289_p0 }
   0x6   :  { %297 = shalt.err (!%p294_p2)
}
   0x7   :  { %s298_s27 = scalar_lea.vmem %s19_s19, 256  ;;  %p303_p4 = scmp.lt.s32.totalorder %s19_s19, %s19_s19 }
   0x8   :  { %p299_p3 = scmp.ne.s32.totalorder %s19_s19, %s298_s27  ;;  %p304_p5 = scmp.lt.s32.totalorder %s298_s27, %s298_s27 }
   0xa   :  { %p305_p6 = por %p304_p5, %p303_p4 }
   0xc   :  { %p306_p7 = pnand %p305_p6, %p299_p3 }
   0xe   :  { %309 = shalt.err (!%p306_p7)
}
   0xf   :  { %s313_s28 = smov 64   ;;  %s314_s29 = smov 4  }
  0x10   :  { %24 = dma.hbm_to_vmem [thread:$0]  %s387_s1, 256, %s19_s19, [#allocation3], %s313_s28, %s313_s28, %s314_s29  }
  0x11   :  { %310 = dma.done.wait [#allocation3], 256  }
  0x12   :  { %311 = vsyncadd [#allocation3], 4294967040  ;;  %v315_v0 = vmov 0.0   ;;  %vm316_vm0 = vmmov 0   ;;  %v274_v1 = vld [vmem:[#allocation2] sm:$0xff]   ;;  %v275_v2 = vld [vmem:[#allocation2 + $0x8] sm:$0xff]  }
  0x13   :  { %249 = vmatprep.subr.bf16.mxu0 %v315_v0  ;;  %253 = vmatprep.mubr.msk.bf16.mxu0 %vm316_vm0, %v315_v0  ;;  %v35_v3 = vld [vmem:[%s386_s0] sm:$0xff]  ;;  %v36_v4 = vld [vmem:[%s386_s0 + $0x8] sm:$0xff]  ;;  %vm61_vm1 = vcmask 261120   ;;  %v278_v8 = vld [vmem:[%s389_s3 + $0x10] sm:$0xff]   ;;  %vm148_vm2 = vcmask 523264  }
  0x14   :  { %257 = vmatprep.subr.bf16.mxu1 %v315_v0  ;;  %265 = vmatprep.mubr.msk.bf16.mxu1 %vm316_vm0, %v315_v0  ;;  %v276_v5 = vld [vmem:[%s389_s3] sm:$0xff]   ;;  %v277_v6 = vld [vmem:[%s389_s3 + $0x8] sm:$0xff]   ;;  %v37_v7 = vpack.c.bf16 %v36_v4, %v35_v3  ;;  %v279_v9 = vld [vmem:[%s389_s3 + $0x18] sm:$0xff]  }
  0x15   :  { %250 = vmatpush3.bf16.msra.mxu0 %v274_v1  ;;  %258 = vmatpush3.bf16.msra.mxu1 %v276_v5  ;;  %v220_v10 = vld [vmem:[%s388_s2] ss:$0 sm:$0xff] }
  0x16   :  { %251 = vmatprep.subr.bf16.mxu0 %v315_v0  ;;  %259 = vmatprep.subr.bf16.mxu1 %v315_v0  ;;  %v224_v20 = vld [vmem:[%s390_s4] ss:$0 sm:$0xff] }
  0x19   :  { %252 = vmatpush3.bf16.msra.mxu0 %v275_v2  ;;  %260 = vmatpush3.bf16.msra.mxu1 %v277_v6 }
  0x1a   :  { %261 = vmatprep.subr.bf16.mxu1 %v315_v0 }
  0x1c   :  { %254 = vmatmul.mubr.msk.bf16.vlgmr.msra.gmra.mrb[0].mxu0 %vm61_vm1, %v37_v7 }
  0x1d   :  { %262 = vmatpush3.bf16.msra.mxu1 %v278_v8 }
  0x1e   :  { %263 = vmatprep.subr.bf16.mxu1 %v315_v0 }
  0x21   :  { %264 = vmatpush3.bf16.msra.mxu1 %v279_v9 }
  0xef   :  { %v99_v11 = vpop.f32.mrb[0].mxu0 }
  0xf0   :  { %v100_v12 = vadd.f32 %v220_v10, %v99_v11  ;;  %v255_v13 = vpop.f32.mrb[1].mxu0 }
  0xf1   :  { %v102_v14 = vpop.f32.mrb[2].mxu0 }
  0xf2   :  { %v103_v15 = vadd.f32 %v220_v10, %v102_v14  ;;  %v256_v16 = vpop.f32.mrb[3].mxu0  ;;  %v106_v17 = vmax.f32 %v100_v12, 0.0 }
  0xf4   :  { %v107_v18 = vmax.f32 %v103_v15, 0.0 }
  0xf6   :  { %v108_v19 = vpack.c.bf16 %v107_v18, %v106_v17 }
  0xf8   :  { %266 = vmatmul.mubr.msk.bf16.vlgmr.msra.gmra.mrb[0].mxu1 %vm148_vm2, %v108_v19 }
 0x1cb   :  { %v186_v21 = vpop.f32.mrb[0].mxu1 }
 0x1cc   :  { %v187_v22 = vadd.f32 %v224_v20, %v186_v21  ;;  %v267_v23 = vpop.f32.mrb[1].mxu1 }
 0x1cd   :  { %v189_v24 = vpop.f32.mrb[2].mxu1 }
 0x1ce   :  { %v230_v25 = vmul.f32 -1.442695, %v187_v22  ;;  %v190_v26 = vadd.f32 %v224_v20, %v189_v24  ;;  %v268_v27 = vpop.f32.mrb[3].mxu1 }
 0x1d0   :  { %280 = vpow2.f32 %v230_v25  ;;  %v231_v28 = vmul.f32 -1.442695, %v190_v26 }
 0x1d2   :  { %282 = vpow2.f32 %v231_v28 }
 0x1da   :  { %v281_v29 = vpop.eup %280 }
 0x1db   :  { %v199_v30 = vadd.f32 1.0, %v281_v29 }
 0x1dc   :  { %v283_v31 = vpop.eup %282 }
 0x1dd   :  { %v200_v32 = vadd.f32 1.0, %v283_v31  ;;  %284 = vrcp.f32 %v199_v30 }
 0x1df   :  { %286 = vrcp.f32 %v200_v32 }
 0x1e7   :  { %v285_v33 = vpop.eup %284 }
 0x1e9   :  { %v287_v34 = vpop.eup %286 }
 0x1ea   :  { %v239_v35 = vpack.c.bf16 %v287_v34, %v285_v33 }
 0x1ec   :  { %240 = vst [vmem:[%s391_s5] sm:$0xff] %v239_v35  }
 0x1ed   :  { %219 = vsyncpa [#allocation3], 1 }

</bundles_post_ra>
